<compile_context>
chip_gen: v6e
topology: v6e:2x2x1
jax: 0.10.0
libtpu: 0.0.40
codegen_flags: <defaults>
</compile_context>

<pallas_src>
import jax
import jax.numpy as jnp
from jax.experimental import pallas as pl
from jax.experimental.pallas import tpu as pltpu


def _relation_attention_kernel(p_ref, x_ref, mask_ref,
                               wv_ref, bv_ref, vk_ref,
                               wg1_ref, wg12_ref, bg_ref,
                               o_ref):
    p = p_ref[...]                                    # (TB, C, H) f32
    x = x_ref[...]                                    # (TB, L, H) f32
    tb, c, h = p.shape
    l = x.shape[1]

    # ---- value projection: the single (H, H) MXU matmul per grid step ----
    v = (jnp.dot(x.reshape(tb * l, h), wv_ref[...],
                 preferred_element_type=jnp.float32)
         + bv_ref[...]).reshape(tb, l, h)             # (TB, L, H)

    # ---- key-side score, produced directly in (TB, 1, L) row form (L on lanes) ----
    # sk[b,0,l] = x[b,l,:] . (wk.T @ ws2); all l-constant score terms (q projection,
    # biases) cancel in the softmax and are omitted.
    vk_b = jnp.broadcast_to(vk_ref[...], (tb, 1, h))  # (TB, 1, H)
    sk = jnp.einsum("boh,blh->bol", vk_b, x,
                    preferred_element_type=jnp.float32)           # (TB, 1, L)

    # ---- additive mask built in-kernel (one VPU FMA) + softmax over L (lanes) ----
    score = sk + (mask_ref[...] - 1.0) * 1e9                       # (TB, 1, L)
    score = score - jnp.max(score, axis=-1, keepdims=True)
    e = jnp.exp(score)
    attn = e / jnp.sum(e, axis=-1, keepdims=True)                  # exact division

    # ---- context vector (attention weights are c-independent) ----
    ctx = jnp.einsum("bol,blh->boh", attn, v,
                     preferred_element_type=jnp.float32)           # (TB, 1, H)
    out = ctx + p                                                  # (TB, C, H)

    # ---- gate: sigmoid(out.wg1 + p.wg2 + bg) == sigmoid(ctx.wg1 + p.(wg1+wg2) + bg)
    # Done as lane reductions (no MXU launch).
    s_ctx = jnp.sum(ctx * wg1_ref[...], axis=-1, keepdims=True)    # (TB, 1, 1)
    s_p = jnp.sum(p * wg12_ref[...], axis=-1, keepdims=True)       # (TB, C, 1)
    g = jax.nn.sigmoid(s_ctx + s_p + bg_ref[0, 0])                 # (TB, C, 1)

    o_ref[...] = g * out + (1.0 - g) * p


def _num_tensorcores_per_chip():
    """Best-effort chip detection: only v7x has 2 TensorCores per chip."""
    try:
        kind = jax.devices()[0].device_kind.lower()
    except Exception:
        return 1
    return 2 if "v7" in kind else 1


def _pick_batch_tile(B, *, num_tc=1, cap=16):
    """Shortest possible grid (every step costs ~0.35us of fixed overhead):
    largest divisor of B that is <= cap.  Only on multi-TC chips (v7x) do we
    additionally require the step count to be a multiple of num_tc so the
    'parallel' megacore split is balanced."""
    divisors = [d for d in range(1, B + 1) if B % d == 0 and d <= cap]
    if not divisors:
        divisors = [1]
    if num_tc > 1:
        balanced = [d for d in divisors if (B // d) % num_tc == 0]
        if balanced:
            return max(balanced)
    return max(divisors)


def prepare_weights(params):
    """One-time fold of the module's weights into kernel-ready arrays.
    wq, bq, ws[:, :H], bs and bk are dropped: they only add l-constant terms to the
    pre-softmax score, which the softmax over l is invariant to."""
    H = params["wv"].shape[0]
    wg1 = params["wg"][0, :H]
    wg2 = params["wg"][0, H:]
    return {
        "wvT": params["wv"].T.astype(jnp.float32),                               # (H, H)
        "bv": params["bv"].reshape(1, H).astype(jnp.float32),                    # (1, H)
        "vk": (params["wk"].T @ params["ws"][0, H:]).reshape(1, H).astype(jnp.float32),
        "wg1": wg1.reshape(1, H).astype(jnp.float32),                            # (1, H)
        "wg12": (wg1 + wg2).reshape(1, H).astype(jnp.float32),                   # (1, H)
        "bg": params["bg"].reshape(1, 1).astype(jnp.float32),                    # SMEM scalar
    }


def relation_attention(p, x, weights, mask=None):
    if "wvT" not in weights:        # raw nn.Module-style params were passed
        weights = prepare_weights(weights)

    B, C, H = p.shape
    _, L, _ = x.shape

    if mask is None:
        mask3 = jnp.ones((B, 1, L), jnp.float32)
    else:
        mask3 = mask.astype(jnp.float32).reshape(B, 1, L)

    TB = _pick_batch_tile(B, num_tc=_num_tensorcores_per_chip(), cap=16)
    grid = (B // TB,)

    in_specs = [
        pl.BlockSpec((TB, C, H), lambda b: (b, 0, 0)),   # p
        pl.BlockSpec((TB, L, H), lambda b: (b, 0, 0)),   # x
        pl.BlockSpec((TB, 1, L), lambda b: (b, 0, 0)),   # mask (raw, bias built in-kernel)
        pl.BlockSpec((H, H), lambda b: (0, 0)),          # wv.T
        pl.BlockSpec((1, H), lambda b: (0, 0)),          # bv
        pl.BlockSpec((1, H), lambda b: (0, 0)),          # vk = wk.T @ ws2
        pl.BlockSpec((1, H), lambda b: (0, 0)),          # wg1
        pl.BlockSpec((1, H), lambda b: (0, 0)),          # wg1 + wg2
        pl.BlockSpec(memory_space=pltpu.MemorySpace.SMEM),  # bg scalar
    ]
    out_specs = pl.BlockSpec((TB, C, H), lambda b: (b, 0, 0))

    return pl.pallas_call(
        _relation_attention_kernel,
        out_shape=jax.ShapeDtypeStruct((B, C, H), jnp.float32),
        grid=grid,
        in_specs=in_specs,
        out_specs=out_specs,
        compiler_params=pltpu.CompilerParams(
            dimension_semantics=("parallel",),
            # Per-step footprint is ~100 KB; 32 MiB fits every generation incl. v7x.
            vmem_limit_bytes=32 * 1024 * 1024,
        ),
    )(p.astype(jnp.float32), x.astype(jnp.float32), mask3,
      weights["wvT"], weights["bv"], weights["vk"],
      weights["wg1"], weights["wg12"], weights["bg"])


def relation_attention_reference(p, x, params, mask=None):
    """Pure-JAX transcription of the full PyTorch forward (for verification)."""
    H = p.shape[-1]
    q = p @ params["wq"].T + params["bq"]
    k = x @ params["wk"].T + params["bk"]
    v = x @ params["wv"].T + params["bv"]
    sq = q @ params["ws"][0, :H]
    sk = k @ params["ws"][0, H:]
    score = sq[:, :, None] + sk[:, None, :] + params["bs"][0]
    if mask is not None:
        inv = 1.0 - mask[:, None, :]
        score = jnp.where(inv == 1.0, -1e9, score)
    score = jax.nn.softmax(score, axis=2)
    out = jnp.einsum("bcl,bld->bcd", score, v) + p
    gl = out @ params["wg"][0, :H] + p @ params["wg"][0, H:] + params["bg"][0]
    g = jax.nn.sigmoid(gl)[..., None]
    return g * out + (1.0 - g) * p


def init_params(key, hidden):
    ks = jax.random.split(key, 10)
    s = 1.0 / jnp.sqrt(hidden)
    return {
        "wq": jax.random.uniform(ks[0], (hidden, hidden), jnp.float32, -s, s),
        "bq": jax.random.uniform(ks[1], (hidden,), jnp.float32, -s, s),
        "wk": jax.random.uniform(ks[2], (hidden, hidden), jnp.float32, -s, s),
        "bk": jax.random.uniform(ks[3], (hidden,), jnp.float32, -s, s),
        "wv": jax.random.uniform(ks[4], (hidden, hidden), jnp.float32, -s, s),
        "bv": jax.random.uniform(ks[5], (hidden,), jnp.float32, -s, s),
        "ws": jax.random.uniform(ks[6], (1, 2 * hidden), jnp.float32, -s, s),
        "bs": jax.random.uniform(ks[7], (1,), jnp.float32, -s, s),
        "wg": jax.random.uniform(ks[8], (1, 2 * hidden), jnp.float32, -s, s),
        "bg": jax.random.uniform(ks[9], (1,), jnp.float32, -s, s),
    }


if __name__ == "__main__":
    B, C, L, H = 2, 8, 8, 32
    key = jax.random.PRNGKey(0)
    kp, kx, km, kw = jax.random.split(key, 4)

    p = jax.random.normal(kp, (B, C, H), jnp.float32)
    x = jax.random.normal(kx, (B, L, H), jnp.float32)
    # binary mask over the memory sequence (1 = valid, 0 = masked)
    mask = (jax.random.uniform(km, (B, L)) > 0.2).astype(jnp.float32)
    mask = mask.at[:, 0].set(1.0)  # keep at least one valid position per row
    params = init_params(kw, H)

    weights = prepare_weights(params)          # one-time weight fold (hoisted per review)
    run = jax.jit(relation_attention)
    out = run(p, x, weights, mask)
    out = jax.block_until_ready(out)

    ref = relation_attention_reference(p, x, params, mask=mask)
    assert out.shape == (B, C, H)
    err = jnp.max(jnp.abs(out - ref))
    assert jnp.allclose(out, ref, atol=1e-4, rtol=1e-4), f"max err {err}"

    print("KERNEL_OK")
</pallas_src>

<mosaic_0001>
module attributes {stable_mosaic.version = 11 : i64} {
  func.func @_relation_attention_kernel(%arg0: i32, %arg1: memref<2x8x32xf32, #tpu.memory_space<vmem>>, %arg2: memref<2x8x32xf32, #tpu.memory_space<vmem>>, %arg3: memref<2x1x8xf32, #tpu.memory_space<vmem>>, %arg4: memref<32x32xf32, #tpu.memory_space<vmem>>, %arg5: memref<1x32xf32, #tpu.memory_space<vmem>>, %arg6: memref<1x32xf32, #tpu.memory_space<vmem>>, %arg7: memref<1x32xf32, #tpu.memory_space<vmem>>, %arg8: memref<1x32xf32, #tpu.memory_space<vmem>>, %arg9: memref<1x1xf32, #tpu.memory_space<smem>>, %arg10: memref<2x8x32xf32, #tpu.memory_space<vmem>>) attributes {dimension_semantics = [#tpu.dimension_semantics<parallel>], iteration_bounds = array<i64: 1>, scalar_prefetch = 0 : i64, scratch_operands = 0 : i64, tpu.core_type = #tpu.core_type<tc>, window_params = [{transform_indices = @transform_0, window_bounds = array<i64: 2, 8, 32>}, {transform_indices = @transform_1, window_bounds = array<i64: 2, 8, 32>}, {transform_indices = @transform_2, window_bounds = array<i64: 2, 1, 8>}, {pipeline_mode = #tpu.pipeline_mode<synchronous>, transform_indices = @transform_3, window_bounds = array<i64: 32, 32>}, {pipeline_mode = #tpu.pipeline_mode<synchronous>, transform_indices = @transform_4, window_bounds = array<i64: 1, 32>}, {pipeline_mode = #tpu.pipeline_mode<synchronous>, transform_indices = @transform_5, window_bounds = array<i64: 1, 32>}, {pipeline_mode = #tpu.pipeline_mode<synchronous>, transform_indices = @transform_6, window_bounds = array<i64: 1, 32>}, {pipeline_mode = #tpu.pipeline_mode<synchronous>, transform_indices = @transform_7, window_bounds = array<i64: 1, 32>}, {transform_indices = @transform_8, window_bounds = array<i64: 1, 1>}, {transform_indices = @transform_9, window_bounds = array<i64: 2, 8, 32>}]} {
    %c0 = arith.constant 0 : index
    %c0_0 = arith.constant 0 : index
    %c0_1 = arith.constant 0 : index
    %0 = vector.load %arg1[%c0, %c0_0, %c0_1] : memref<2x8x32xf32, #tpu.memory_space<vmem>>, vector<2x8x32xf32>
    %c0_2 = arith.constant 0 : index
    %c0_3 = arith.constant 0 : index
    %c0_4 = arith.constant 0 : index
    %1 = vector.load %arg2[%c0_2, %c0_3, %c0_4] : memref<2x8x32xf32, #tpu.memory_space<vmem>>, vector<2x8x32xf32>
    %2 = vector.shape_cast %1 : vector<2x8x32xf32> to vector<16x32xf32>
    %c0_5 = arith.constant 0 : index
    %c0_6 = arith.constant 0 : index
    %3 = vector.load %arg4[%c0_5, %c0_6] : memref<32x32xf32, #tpu.memory_space<vmem>>, vector<32x32xf32>
    %cst = arith.constant dense<0.000000e+00> : vector<16x32xf32>
    %4 = tpu.matmul %2, %3, %cst {dimension_numbers = #tpu.dot_dimension_numbers<[1], [0], [0], [1], [0, 0, 1, 1], [], []>} : vector<16x32xf32>, vector<32x32xf32>, vector<16x32xf32> -> vector<16x32xf32>
    %c0_7 = arith.constant 0 : index
    %c0_8 = arith.constant 0 : index
    %5 = vector.load %arg5[%c0_7, %c0_8] : memref<1x32xf32, #tpu.memory_space<vmem>>, vector<1x32xf32>
    %6 = vector.broadcast %5 : vector<1x32xf32> to vector<16x32xf32>
    %7 = arith.addf %4, %6 : vector<16x32xf32>
    %8 = vector.shape_cast %7 : vector<16x32xf32> to vector<2x8x32xf32>
    %c0_9 = arith.constant 0 : index
    %c0_10 = arith.constant 0 : index
    %9 = vector.load %arg6[%c0_9, %c0_10] : memref<1x32xf32, #tpu.memory_space<vmem>>, vector<1x32xf32>
    %10 = vector.shape_cast %9 : vector<1x32xf32> to vector<1x1x32xf32>
    %11 = vector.broadcast %10 : vector<1x1x32xf32> to vector<2x1x32xf32>
    "tpu.trace_start"() <{level = 10 : i32, message = "boh,blh->bol"}> : () -> ()
    %cst_11 = arith.constant dense<0.000000e+00> : vector<2x1x8xf32>
    %12 = tpu.matmul %11, %1, %cst_11 {dimension_numbers = #tpu.dot_dimension_numbers<[2], [2], [1], [1], [0, 0, 0, 1, 1, 1], [0], [0]>} : vector<2x1x32xf32>, vector<2x8x32xf32>, vector<2x1x8xf32> -> vector<2x1x8xf32>
    "tpu.trace_stop"() : () -> ()
    %c0_12 = arith.constant 0 : index
    %c0_13 = arith.constant 0 : index
    %c0_14 = arith.constant 0 : index
    %13 = vector.load %arg3[%c0_12, %c0_13, %c0_14] : memref<2x1x8xf32, #tpu.memory_space<vmem>>, vector<2x1x8xf32>
    %cst_15 = arith.constant 1.000000e+00 : f32
    %14 = vector.broadcast %cst_15 : f32 to vector<2x1x8xf32>
    %15 = arith.subf %13, %14 : vector<2x1x8xf32>
    %cst_16 = arith.constant 1.000000e+09 : f32
    %16 = vector.broadcast %cst_16 : f32 to vector<2x1x8xf32>
    %17 = arith.mulf %15, %16 : vector<2x1x8xf32>
    %18 = arith.addf %12, %17 : vector<2x1x8xf32>
    %cst_17 = arith.constant dense<0xFF800000> : vector<2x1xf32>
    %19 = vector.multi_reduction <maximumf>, %18, %cst_17 [2] : vector<2x1x8xf32> to vector<2x1xf32>
    %20 = vector.shape_cast %19 : vector<2x1xf32> to vector<2x1x1xf32>
    %21 = vector.broadcast %20 : vector<2x1x1xf32> to vector<2x1x8xf32>
    %22 = arith.subf %18, %21 : vector<2x1x8xf32>
    %23 = math.exp %22 : vector<2x1x8xf32>
    %cst_18 = arith.constant dense<0.000000e+00> : vector<2x1xf32>
    %24 = vector.multi_reduction <add>, %23, %cst_18 [2] : vector<2x1x8xf32> to vector<2x1xf32>
    %25 = vector.shape_cast %24 : vector<2x1xf32> to vector<2x1x1xf32>
    %26 = vector.broadcast %25 : vector<2x1x1xf32> to vector<2x1x8xf32>
    %27 = arith.divf %23, %26 : vector<2x1x8xf32>
    "tpu.trace_start"() <{level = 10 : i32, message = "bol,blh->boh"}> : () -> ()
    %cst_19 = arith.constant dense<0.000000e+00> : vector<2x1x32xf32>
    %28 = tpu.matmul %27, %8, %cst_19 {dimension_numbers = #tpu.dot_dimension_numbers<[2], [1], [1], [2], [0, 0, 0, 1, 1, 2], [0], [0]>} : vector<2x1x8xf32>, vector<2x8x32xf32>, vector<2x1x32xf32> -> vector<2x1x32xf32>
    "tpu.trace_stop"() : () -> ()
    %29 = vector.broadcast %28 : vector<2x1x32xf32> to vector<2x8x32xf32>
    %30 = arith.addf %29, %0 : vector<2x8x32xf32>
    %c0_20 = arith.constant 0 : index
    %c0_21 = arith.constant 0 : index
    %31 = vector.load %arg7[%c0_20, %c0_21] : memref<1x32xf32, #tpu.memory_space<vmem>>, vector<1x32xf32>
    %32 = vector.shape_cast %31 : vector<1x32xf32> to vector<1x1x32xf32>
    %33 = vector.broadcast %32 : vector<1x1x32xf32> to vector<2x1x32xf32>
    %34 = arith.mulf %28, %33 : vector<2x1x32xf32>
    %cst_22 = arith.constant dense<0.000000e+00> : vector<2x1xf32>
    %35 = vector.multi_reduction <add>, %34, %cst_22 [2] : vector<2x1x32xf32> to vector<2x1xf32>
    %36 = vector.shape_cast %35 : vector<2x1xf32> to vector<2x1x1xf32>
    %c0_23 = arith.constant 0 : index
    %c0_24 = arith.constant 0 : index
    %37 = vector.load %arg8[%c0_23, %c0_24] : memref<1x32xf32, #tpu.memory_space<vmem>>, vector<1x32xf32>
    %38 = vector.shape_cast %37 : vector<1x32xf32> to vector<1x1x32xf32>
    %39 = vector.broadcast %38 : vector<1x1x32xf32> to vector<2x8x32xf32>
    %40 = arith.mulf %0, %39 : vector<2x8x32xf32>
    %cst_25 = arith.constant dense<0.000000e+00> : vector<2x8xf32>
    %41 = vector.multi_reduction <add>, %40, %cst_25 [2] : vector<2x8x32xf32> to vector<2x8xf32>
    %42 = vector.shape_cast %41 : vector<2x8xf32> to vector<2x8x1xf32>
    %43 = vector.broadcast %36 : vector<2x1x1xf32> to vector<2x8x1xf32>
    %44 = arith.addf %43, %42 : vector<2x8x1xf32>
    %c0_26 = arith.constant 0 : index
    %c0_27 = arith.constant 0 : index
    %45 = memref.load %arg9[%c0_26, %c0_27] : memref<1x1xf32, #tpu.memory_space<smem>>
    %46 = vector.broadcast %45 : f32 to vector<2x8x1xf32>
    %47 = arith.addf %44, %46 : vector<2x8x1xf32>
    %48 = arith.negf %47 : vector<2x8x1xf32>
    %49 = math.exp %48 : vector<2x8x1xf32>
    %cst_28 = arith.constant 1.000000e+00 : f32
    %50 = vector.broadcast %cst_28 : f32 to vector<2x8x1xf32>
    %51 = arith.addf %50, %49 : vector<2x8x1xf32>
    %52 = arith.divf %50, %51 : vector<2x8x1xf32>
    %53 = vector.broadcast %52 : vector<2x8x1xf32> to vector<2x8x32xf32>
    %54 = arith.mulf %53, %30 : vector<2x8x32xf32>
    %cst_29 = arith.constant 1.000000e+00 : f32
    %55 = vector.broadcast %cst_29 : f32 to vector<2x8x1xf32>
    %56 = arith.subf %55, %52 : vector<2x8x1xf32>
    %57 = vector.broadcast %56 : vector<2x8x1xf32> to vector<2x8x32xf32>
    %58 = arith.mulf %57, %0 : vector<2x8x32xf32>
    %59 = arith.addf %54, %58 : vector<2x8x32xf32>
    %c0_30 = arith.constant 0 : index
    %c0_31 = arith.constant 0 : index
    %c0_32 = arith.constant 0 : index
    %60 = vector.load %arg10[%c0_30, %c0_31, %c0_32] : memref<2x8x32xf32, #tpu.memory_space<vmem>>, vector<2x8x32xf32>
    tpu.vector_store %arg10[%c0_30, %c0_31, %c0_32], %59 {strides = array<i32>} : memref<2x8x32xf32, #tpu.memory_space<vmem>>, vector<2x8x32xf32>,
    return
  }
  func.func @transform_0(%arg0: i32) -> (i32, i32, i32) {
    %c0_i32 = arith.constant 0 : i32
    %c0_i32_0 = arith.constant 0 : i32
    %c0_i32_1 = arith.constant 0 : i32
    return %arg0, %c0_i32, %c0_i32_0 : i32, i32, i32
  }
  func.func @transform_1(%arg0: i32) -> (i32, i32, i32) {
    %c0_i32 = arith.constant 0 : i32
    %c0_i32_0 = arith.constant 0 : i32
    %c0_i32_1 = arith.constant 0 : i32
    return %arg0, %c0_i32, %c0_i32_0 : i32, i32, i32
  }
  func.func @transform_2(%arg0: i32) -> (i32, i32, i32) {
    %c0_i32 = arith.constant 0 : i32
    %c0_i32_0 = arith.constant 0 : i32
    %c0_i32_1 = arith.constant 0 : i32
    return %arg0, %c0_i32, %c0_i32_0 : i32, i32, i32
  }
  func.func @transform_3(%arg0: i32) -> (i32, i32) {
    %c0_i32 = arith.constant 0 : i32
    %c0_i32_0 = arith.constant 0 : i32
    %c0_i32_1 = arith.constant 0 : i32
    return %c0_i32, %c0_i32_0 : i32, i32
  }
  func.func @transform_4(%arg0: i32) -> (i32, i32) {
    %c0_i32 = arith.constant 0 : i32
    %c0_i32_0 = arith.constant 0 : i32
    %c0_i32_1 = arith.constant 0 : i32
    return %c0_i32, %c0_i32_0 : i32, i32
  }
  func.func @transform_5(%arg0: i32) -> (i32, i32) {
    %c0_i32 = arith.constant 0 : i32
    %c0_i32_0 = arith.constant 0 : i32
    %c0_i32_1 = arith.constant 0 : i32
    return %c0_i32, %c0_i32_0 : i32, i32
  }
  func.func @transform_6(%arg0: i32) -> (i32, i32) {
    %c0_i32 = arith.constant 0 : i32
    %c0_i32_0 = arith.constant 0 : i32
    %c0_i32_1 = arith.constant 0 : i32
    return %c0_i32, %c0_i32_0 : i32, i32
  }
  func.func @transform_7(%arg0: i32) -> (i32, i32) {
    %c0_i32 = arith.constant 0 : i32
    %c0_i32_0 = arith.constant 0 : i32
    %c0_i32_1 = arith.constant 0 : i32
    return %c0_i32, %c0_i32_0 : i32, i32
  }
  func.func @transform_8(%arg0: i32) -> (i32, i32) {
    %c0_i32 = arith.constant 0 : i32
    %c0_i32_0 = arith.constant 0 : i32
    %c0_i32_1 = arith.constant 0 : i32
    return %c0_i32, %c0_i32_0 : i32, i32
  }
  func.func @transform_9(%arg0: i32) -> (i32, i32, i32) {
    %c0_i32 = arith.constant 0 : i32
    %c0_i32_0 = arith.constant 0 : i32
    %c0_i32_1 = arith.constant 0 : i32
    return %arg0, %c0_i32, %c0_i32_0 : i32, i32, i32
  }
}

</mosaic_0001>

<bundles_post_ra>
// kernel: relation_attention.1
= control target key start
LH: loop header
LB: loop body
LE: loop exit
PB: predicated region body
PF: predicated region fallthrough
CT: control target
= control target key end

     0   :  { %15 = vsyncpa [#allocation4], 0  ;;  %s871_s0 = inlined_call_operand.hbm [shape: f32[2,8,32], index: 0, kind: input, shape index: {}]   ;;  %s872_s1 = inlined_call_operand.hbm [shape: f32[2,8,32], index: 1, kind: input, shape index: {}]   ;;  %s873_s2 = inlined_call_operand.vmem [shape: f32[2,1,8], index: 2, kind: input, shape index: {}]   ;;  %s874_s3 = inlined_call_operand.hbm [shape: f32[32,32], index: 3, kind: input, shape index: {}]   ;;  %s875_s4 = inlined_call_operand.vmem [shape: f32[1,32], index: 4, kind: input, shape index: {}]   ;;  %s876_s5 = inlined_call_operand.vmem [shape: f32[1,32], index: 5, kind: input, shape index: {}]   ;;  %s877_s6 = inlined_call_operand.vmem [shape: f32[1,32], index: 6, kind: input, shape index: {}]   ;;  %s878_s7 = inlined_call_operand.vmem [shape: f32[1,32], index: 7, kind: input, shape index: {}]   ;;  %s879_s8 = inlined_call_operand.<no memory space> [shape: f32[1,1], index: 8, kind: input, shape index: {}]   ;;  %s880_s9 = inlined_call_operand.hbm [shape: f32[2,8,32], index: 9, kind: output, shape index: {}]  }
   0x1   :  { %16 = vsyncpa [#allocation7], 0 }
   0x2   :  { %17 = vsyncpa [#allocation5], 0  ;;  %s750_s30 = smov [#allocation6]   ;;  %s751_s11 = smov [#allocation3]  }
   0x3   :  { %s35_s10 = sshll.u32 %s750_s30, 4  ;;  %s23_s12 = sshll.u32 %s751_s11, 4  ;;  %s36_s10 = int_to_ptr.vmem [resolvable:$true] %s35_s10  ;;  %s24_s12 = int_to_ptr.vmem [resolvable:$true] %s23_s12 }
   0x4   :  { %s672_s13 = scalar_lea.vmem %s36_s10, 256  ;;  %p677_p1 = scmp.lt.s32.totalorder %s36_s10, %s36_s10 }
   0x5   :  { %p673_p0 = scmp.ne.s32.totalorder %s36_s10, %s672_s13  ;;  %p678_p2 = scmp.lt.s32.totalorder %s672_s13, %s672_s13 }
   0x7   :  { %p679_p3 = por %p678_p2, %p677_p1 }
   0x9   :  { %p680_p4 = pnand %p679_p3, %p673_p0 }
   0xb   :  { %683 = shalt.err (!%p680_p4)
}
   0xc   :  { %s752_s14 = smov 128   ;;  %s753_s15 = smov 8  }
   0xd   :  { %41 = dma.hbm_to_vmem [thread:$0]  %s872_s1, 256, %s36_s10, [#allocation7], %s752_s14, %s752_s14, %s753_s15  }
   0xe   :  { %s692_s18 = scalar_lea.vmem %s24_s12, 256  ;;  %p697_p6 = scmp.lt.s32.totalorder %s24_s12, %s24_s12 }
   0xf   :  { %p693_p5 = scmp.ne.s32.totalorder %s24_s12, %s692_s18  ;;  %p698_p7 = scmp.lt.s32.totalorder %s692_s18, %s692_s18 }
  0x11   :  { %p699_p8 = por %p698_p7, %p697_p6 }
  0x13   :  { %p700_p9 = pnand %p699_p8, %p693_p5 }
  0x15   :  { %703 = shalt.err (!%p700_p9)
}
  0x16   :  { %29 = dma.hbm_to_vmem [thread:$0]  %s871_s0, 256, %s24_s12, [#allocation4], %s752_s14, %s752_s14, %s753_s15  }
  0x17   :  { %s754_s21 = smov [#allocation8]  }
  0x18   :  { %s49_s22 = sshll.u32 %s754_s21, 4  ;;  %s50_s22 = int_to_ptr.vmem [resolvable:$true] %s49_s22 }
  0x19   :  { %s712_s23 = scalar_lea.vmem %s50_s22, 512  ;;  %p717_p11 = scmp.lt.s32.totalorder %s50_s22, %s50_s22 }
  0x1a   :  { %p713_p10 = scmp.ne.s32.totalorder %s50_s22, %s712_s23  ;;  %p718_p12 = scmp.lt.s32.totalorder %s712_s23, %s712_s23 }
  0x1c   :  { %p719_p13 = por %p718_p12, %p717_p11 }
  0x1e   :  { %p720_p0 = pnand %p719_p13, %p713_p10 }
  0x20   :  { %723 = shalt.err (!%p720_p0)
}
  0x21   :  { %55 = dma.hbm_to_vmem [thread:$0]  %s874_s3, 512, %s50_s22, [#allocation7], %s752_s14, %s752_s14, %s753_s15  }
  0x22   :  { %744 = dma.done.wait [#allocation4], 256  }
  0x23   :  { %745 = vsyncadd [#allocation4], 4294967040 }
  0x24   :  { %746 = dma.done.wait [#allocation7], 768  }
  0x25   :  { %747 = vsyncadd [#allocation7], 4294966528  ;;  %v755_v0 = vmov 0.0   ;;  %vm756_vm0 = vmmov 0   ;;  %vm90_vm1 = vcmask 261120   ;;  %v77_v1 = vld [vmem:[#allocation6] sm:$0xff]  ;;  %v492_v59 = vlaneseq }
  0x26   :  { %620 = vmatprep.subr.mxu1 %v755_v0  ;;  %622 = vmatprep.mubr.msk.f32.mxu1 %vm756_vm0, %v755_v0  ;;  %v172_v2 = vld [vmem:[%s876_s5] sm:$0x1]  ;;  %v78_v3 = vld [vmem:[#allocation6 + $0x8] sm:$0xff]  ;;  %v81_v5 = vld [vmem:[#allocation8 + $0x10] sm:$0xff]  ;;  %vm322_vm2 = vcmask 57344   ;;  %vm345_vm3 = vcmask 64512  }
  0x27   :  { %621 = vmatpush3.xpose.msk.msra.mxu1 %vm90_vm1, %v77_v1  ;;  %617 = vmatprep.mubr.msk.f32.mxu0 %vm90_vm1, %v77_v1  ;;  %v82_v4 = vld [vmem:[#allocation8 + $0x18] sm:$0xff]  ;;  %v80_v6 = vld [vmem:[#allocation8 + $0x8] sm:$0xff]  ;;  %v79_v7 = vld [vmem:[#allocation8] sm:$0xff]  ;;  %vm505_vm4 = vcmask 253952   ;;  %v493_v60 = vshrl.u32 %v492_v59, 7  ;;  %v538_v1 = vstv %s879_s8  ;;  %s757_s8 = smov [#allocation9]  }
  0x28   :  { %625 = vmatprep.subr.mxu1 %v755_v0  ;;  %609 = vmatprep.subr.mxu0 %v82_v4  ;;  %v173_v8 = vld [vmem:[%s873_s2] sm:$0x1]  ;;  %v174_v10 = vld [vmem:[%s873_s2 + $0x1] sm:$0x1]  ;;  %v76_v51 = vld [vmem:[#allocation3 + $0x8] sm:$0xff]  ;;  %s568_s11 = sshll.u32 %s757_s8, 4  ;;  %s569_s11 = int_to_ptr.vmem [resolvable:$true] %s568_s11 }
  0x29   :  { %610 = vmatpush3.msra.mxu0 %v82_v4  ;;  %v584_v9 = vadd.f32 -1.0, %v173_v8  ;;  %v585_v12 = vadd.f32 -1.0, %v174_v10  ;;  %v581_v33 = vld [vmem:[%s875_s4] ss:$0 sm:$0xff]  ;;  %v494_v62 = vsub.s32 0, %v493_v60  ;;  %s724_s12 = scalar_lea.vmem %s569_s11, 256  ;;  %p729_p2 = scmp.lt.s32.totalorder %s569_s11, %s569_s11 }
  0x2a   :  { %623 = vmatmul.mubr.msk.f32.vlgmr.msra.gmra.mxu1 %vm90_vm1, %v172_v2  ;;  %611 = vmatprep.subr.mxu0 %v81_v5  ;;  %v502_v43 = vld [vmem:[%s877_s6] sm:$0x1]  ;;  %p725_p1 = scmp.ne.s32.totalorder %s569_s11, %s724_s12  ;;  %p730_p3 = scmp.lt.s32.totalorder %s724_s12, %s724_s12 }
  0x2b   :  { %626 = vmatpush3.xpose.msk.msra.mxu1 %vm90_vm1, %v78_v3  ;;  %627 = vmatprep.mubr.msk.f32.mxu1 %vm756_vm0, %v755_v0  ;;  %v177_v11 = vmul.f32 1e+09, %v584_v9  ;;  %v178_v15 = vmul.f32 1e+09, %v585_v12  ;;  %v592_v44 = vld [vmem:[%s878_s7] ss:$0 sm:$0xff] }
  0x2c   :  { %635 = vmatprep.subr.mxu1 %v755_v0  ;;  %612 = vmatpush3.msra.mxu0 %v81_v5  ;;  %v75_v45 = vld [vmem:[#allocation3] sm:$0xff]  ;;  %v520_v55 = vmul.f32 %v592_v44, %v76_v51  ;;  %p731_p4 = por %p730_p3, %p729_p2 }
  0x2d   :  { %613 = vmatprep.subr.mxu0 %v80_v6  ;;  %v519_v48 = vmul.f32 %v592_v44, %v75_v45 }
  0x2e   :  { %628 = vmatmul.mubr.msk.f32.vlgmr.msra.gmra.mxu1 %vm90_vm1, %v172_v2  ;;  %614 = vmatpush3.msra.mxu0 %v80_v6  ;;  %v524_v58 = vsel %vm90_vm1, %v520_v55, 0.0  ;;  %p732_p5 = pnand %p731_p4, %p725_p1 }
  0x2f   :  { %637 = vmatprep.mubr.msk.f32.mxu1 %vm756_vm0, %v755_v0  ;;  %615 = vmatprep.subr.mxu0 %v79_v7  ;;  %v521_v54 = vsel %vm90_vm1, %v519_v48, 0.0 }
  0x30   :  { %616 = vmatpush3.msra.mxu0 %v79_v7 }
  0x31   :  { %618 = vmatmul.mubr.msk.f32.vlgmr.msra.gmra.mxu0 %vm90_vm1, %v78_v3  ;;  %630 = vmatprep.subr.mxu0 %v755_v0 }
  0x32   :  { %632 = vmatprep.mubr.msk.f32.mxu0 %vm756_vm0, %v755_v0 }
  0xea   :  { %v248_v13 = vpop.f32.mrf.mxu1 }
  0xeb   :  { %v249_v14 = vadd.f32 %v248_v13, %v177_v11 }
  0xec   :  { %v624_v16 = vpop.f32.mrf.mxu1 }
  0xed   :  { %v323_v17 = vsel %vm322_vm2, %v249_v14, -inf }
  0xee   :  { %324 = vmax.xlane.f32.xlu0 %v323_v17  ;;  %v318_v18 = vpop.f32.mrf.mxu1 }
  0xef   :  { %v319_v19 = vadd.f32 %v318_v18, %v178_v15 }
  0xf0   :  { %v629_v20 = vpop.f32.mrf.mxu1 }
  0xf1   :  { %v326_v21 = vsel %vm322_vm2, %v319_v19, -inf  ;;  %v619_v32 = vpop.f32.mrf.mxu0 }
  0xf2   :  { %327 = vmax.xlane.f32.xlu0 %v326_v21  ;;  %v169_v34 = vadd.f32 %v619_v32, %v581_v33 }
  0xf3   :  { %v163_v35 = vpop.f32.mrf.mxu0 }
  0xf4   :  { %v164_v36 = vadd.f32 %v581_v33, %v163_v35  ;;  %636 = vmatpush3.msra.mxu1 %v169_v34 }
  0xf6   :  { %631 = vmatpush3.msra.mxu0 %v164_v36 }
 0x177   :  { %v325_v22 = vpop.xlane.xlu0 %324 }
 0x178   :  { %v329_v23 = vsub.f32 %v249_v14, %v325_v22 }
 0x17a   :  { %v331_v24 = vmul.f32 1.442695, %v329_v23 }
 0x17b   :  { %v328_v25 = vpop.xlane.xlu0 %327 }
 0x17c   :  { %648 = vpow2.f32 %v331_v24  ;;  %v330_v26 = vsub.f32 %v319_v19, %v328_v25 }
 0x17e   :  { %v333_v27 = vmul.f32 1.442695, %v330_v26 }
 0x180   :  { %650 = vpow2.f32 %v333_v27 }
 0x189   :  { %v649_v28 = vpop.eup %648 }
 0x18a   :  { %v335_v29 = vsel %vm322_vm2, %v649_v28, 0.0 }
 0x18b   :  { %336 = vadd.xlane.f32.xlu1 %v335_v29 }
 0x18d   :  { %v651_v30 = vpop.eup %650 }
 0x18e   :  { %v338_v31 = vsel %vm322_vm2, %v651_v30, 0.0 }
 0x18f   :  { %339 = vadd.xlane.f32.xlu1 %v338_v31 }
 0x214   :  { %v337_v37 = vpop.xlane.xlu1 %336 }
 0x215   :  { %652 = vrcp.f32 %v337_v37 }
 0x218   :  { %v340_v38 = vpop.xlane.xlu1 %339 }
 0x219   :  { %654 = vrcp.f32 %v340_v38 }
 0x222   :  { %v653_v39 = vpop.eup %652 }
 0x223   :  { %v342_v40 = vmul.f32 %v653_v39, %v649_v28 }
 0x225   :  { %633 = vmatmul.mubr.msk.f32.vlgmr.msra.gmra.mxu0 %vm345_vm3, %v342_v40 }
 0x226   :  { %v655_v41 = vpop.eup %654 }
 0x227   :  { %v344_v42 = vmul.f32 %v655_v41, %v651_v30 }
 0x229   :  { %638 = vmatmul.mubr.msk.f32.vlgmr.msra.gmra.mxu1 %vm345_vm3, %v344_v42 }
 0x2e5   :  { %v415_v46 = vpop.f32.mrf.mxu0 }
 0x2e6   :  { %v503_v47 = vmul.f32 %v502_v43, %v415_v46  ;;  %v495_v15 = vrot.slane %v415_v46, %v494_v62 }
 0x2e7   :  { %v634_v49 = vpop.f32.mrf.mxu0 }
 0x2e8   :  { %v506_v50 = vsel %vm505_vm4, %v503_v47, 0.0  ;;  %v500_v17 = vadd.f32 %v495_v15, %v75_v45 }
 0x2e9   :  { %v488_v52 = vpop.f32.mrf.mxu1  ;;  %507 = vadd.xlane.f32.xlu0 %v506_v50 }
 0x2ea   :  { %v504_v53 = vmul.f32 %v502_v43, %v488_v52  ;;  %v499_v18 = vrot.slane %v488_v52, %v494_v62 }
 0x2eb   :  { %v639_v56 = vpop.f32.mrf.mxu1 }
 0x2ec   :  { %v509_v57 = vsel %vm505_vm4, %v504_v53, 0.0  ;;  %v501_v23 = vadd.f32 %v499_v18, %v76_v51 }
 0x2ed   :  { %510 = vadd.xlane.f32.xlu1 %v509_v57  ;;  %522 = vadd.xlane.f32.xlu0 %v521_v54 }
 0x2f1   :  { %525 = vadd.xlane.f32.xlu1 %v524_v58 }
 0x372   :  { %v508_v61 = vpop.xlane.xlu0 %507 }
 0x373   :  { %v530_v63 = vrot.slane %v508_v61, %v494_v62 }
 0x376   :  { %v511_v0 = vpop.xlane.xlu1 %510  ;;  %v523_v2 = vpop.xlane.xlu0 %522 }
 0x377   :  { %v535_v3 = vadd.f32 %v530_v63, %v523_v2  ;;  %v534_v4 = vrot.slane %v511_v0, %v494_v62 }
 0x379   :  { %v539_v5 = vadd.f32 %v538_v1, %v535_v3 }
 0x37a   :  { %v526_v6 = vpop.xlane.xlu1 %525 }
 0x37b   :  { %v593_v7 = vmul.f32 -1.442695, %v539_v5  ;;  %v536_v8 = vadd.f32 %v534_v4, %v526_v6 }
 0x37d   :  { %656 = vpow2.f32 %v593_v7  ;;  %v540_v9 = vadd.f32 %v538_v1, %v536_v8 }
 0x37f   :  { %v594_v10 = vmul.f32 -1.442695, %v540_v9 }
 0x381   :  { %658 = vpow2.f32 %v594_v10 }
 0x38a   :  { %v657_v11 = vpop.eup %656 }
 0x38b   :  { %v547_v12 = vadd.f32 1.0, %v657_v11 }
 0x38d   :  { %660 = vrcp.f32 %v547_v12 }
 0x38e   :  { %v659_v13 = vpop.eup %658 }
 0x38f   :  { %v548_v14 = vadd.f32 1.0, %v659_v13 }
 0x391   :  { %662 = vrcp.f32 %v548_v14 }
 0x39a   :  { %v661_v16 = vpop.eup %660 }
 0x39b   :  { %v555_v19 = vsub.f32 1.0, %v661_v16  ;;  %v553_v20 = vmul.f32 %v661_v16, %v500_v17 }
 0x39d   :  { %v557_v21 = vmul.f32 %v555_v19, %v75_v45 }
 0x39e   :  { %v663_v22 = vpop.eup %662 }
 0x39f   :  { %v556_v24 = vsub.f32 1.0, %v663_v22  ;;  %v559_v25 = vadd.f32 %v557_v21, %v553_v20  ;;  %v554_v26 = vmul.f32 %v663_v22, %v501_v23 }
 0x3a1   :  { %v558_v27 = vmul.f32 %v556_v24, %v76_v51  ;;  %561 = vst.msk [vmem:[#allocation9] sm:$0xff] %vm90_vm1, %v559_v25 }
 0x3a3   :  { %v560_v28 = vadd.f32 %v558_v27, %v554_v26 }
 0x3a5   :  { %562 = vst.msk [vmem:[#allocation9 + $0x8] sm:$0xff] %vm90_vm1, %v560_v28 }
 0x3a6   :  { %735 = shalt.err (!%p732_p5)
}
 0x3a7   :  { %574 = dma.vmem_to_hbm [thread:$0]  %s569_s11, 256, %s880_s9, [#allocation5], %s752_s14, %s752_s14, %s753_s15  }
 0x3a8   :  { %748 = dma.done.wait [#allocation5], 256  }
 0x3a9   :  { %749 = vsyncadd [#allocation5], 4294967040 }
 0x3aa   :  { %578 = vsyncpa [#allocation4], 1 }
 0x3ab   :  { %579 = vsyncpa [#allocation7], 1 }
 0x3ac   :  { %580 = vsyncpa [#allocation5], 1 }

</bundles_post_ra>
